<compile_context>
chip_gen: v7x
topology: tpu7x:2x2x1
jax: 0.10.0
libtpu: 0.0.40
codegen_flags: <defaults>
</compile_context>

<pallas_src>
import functools

import jax
import jax.numpy as jnp
from jax.experimental import pallas as pl
from jax.experimental.pallas import tpu as pltpu


def _bilinear_up2_matrix(size: int) -> jnp.ndarray:
    """(2*size, size) operator == nn.Upsample(scale_factor=2, bilinear, align_corners=False)."""
    out_size = 2 * size
    r = jnp.arange(out_size, dtype=jnp.float32)
    src = jnp.maximum((r + 0.5) / 2.0 - 0.5, 0.0)          # PyTorch half-pixel, clamped at 0
    i0 = jnp.floor(src).astype(jnp.int32)
    frac = src - i0.astype(jnp.float32)
    i1 = jnp.minimum(i0 + 1, size - 1)
    rows = jnp.arange(out_size, dtype=jnp.int32)
    m = jnp.zeros((out_size, size), dtype=jnp.float32)
    m = m.at[rows, i0].add(1.0 - frac)
    m = m.at[rows, i1].add(frac)
    return m


def _up2_taps(size: int):
    """Static 2-tap stencil of the x2 bilinear (align_corners=False) upsample along one axis."""
    taps = []
    for p in range(2 * size):
        src = max((p + 0.5) / 2.0 - 0.5, 0.0)
        i0 = int(src)
        frac = src - i0
        i1 = min(i0 + 1, size - 1)
        taps.append((i0, 1.0 - frac, i1, frac))
    return tuple(taps)


def _pick_co_tile(co: int, cap: int = 128) -> int:
    if co <= cap:
        return co
    for t in range(cap, 0, -1):
        if co % t == 0 and t % 8 == 0:
            return t
    return co


def _interp_conv_kernel(x_ref, w_ref, uwT_ref, o_ref, *, h_in, w_in, taps):
    # x_ref  : (Ci, H*W)     one batch element, channels x flat spatial (lane dim = H*W)
    # w_ref  : (TCo, Ci)     1x1 conv weight tile
    # uwT_ref: (W, 2W)       transposed width-upsample operator
    # o_ref  : (TCo, 2H*2W)  flat output rows, row-major (p*2W + q)
    # 1x1 conv first (pointwise + linear, so it commutes with the upsample): one MXU matmul.
    y = jnp.dot(w_ref[...], x_ref[...], preferred_element_type=jnp.float32)   # (TCo, H*W) f32
    uwT = uwT_ref[...]

    # Width upsample per input row: (TCo, W) @ (W, 2W) on the MXU (static unroll over H).
    rows_up = []
    for h in range(h_in):
        piece = y[:, h * w_in:(h + 1) * w_in]                                  # (TCo, W)
        rows_up.append(jnp.dot(piece, uwT, preferred_element_type=jnp.float32))  # (TCo, 2W)

    # Height upsample: static 2-tap 0.25/0.75 blend per output row (VPU), exact PyTorch
    # align_corners=False stencil including edge clamping.
    out_rows = []
    for (i0, w0, i1, w1) in taps:
        if i1 == i0 or w1 == 0.0:
            s = w0 + w1
            out_rows.append(rows_up[i0] if s == 1.0 else rows_up[i0] * s)
        else:
            out_rows.append(w0 * rows_up[i0] + w1 * rows_up[i1])

    # Single lane-dense store of the whole output block.
    o_ref[...] = jnp.concatenate(out_rows, axis=-1).astype(o_ref.dtype)


def interp_conv(x_nchw: jnp.ndarray, w_conv: jnp.ndarray) -> jnp.ndarray:
    N, Ci, H, W = x_nchw.shape
    if w_conv.ndim == 4:                       # torch Conv2d weight (Co, Ci, 1, 1)
        w_conv = w_conv[:, :, 0, 0]
    Co = w_conv.shape[0]
    Ho, Wo = 2 * H, 2 * W

    co_tile = _pick_co_tile(Co)
    n_co = Co // co_tile

    dtype = x_nchw.dtype
    uwT = _bilinear_up2_matrix(W).T.astype(dtype)     # (W, 2W); 0.25/0.75 are exact in bf16 too
    w2 = w_conv.astype(dtype)                         # (Co, Ci)
    x_flat = x_nchw.reshape(N, Ci, H * W)             # free metadata reshape

    itemsize = jnp.dtype(dtype).itemsize
    x_blk = Ci * H * W * itemsize
    o_blk = co_tile * Ho * Wo * itemsize
    w_blk = co_tile * Ci * itemsize
    interm = co_tile * (7 * H * W) * 4                # f32 conv result + row buffers (rough)
    vmem_limit = int(2 * (x_blk + o_blk + w_blk) + interm + (4 << 20))
    vmem_limit = max(16 << 20, min(vmem_limit, 48 << 20))   # sized to also fit v7x's 64 MiB VMEM

    flops = int(2 * N * Co * Ci * H * W          # 1x1 conv
                + 2 * N * Co * H * W * Wo        # width upsample matmuls
                + 4 * N * Co * Ho * Wo)          # height 2-tap blends
    bytes_accessed = int((x_flat.size + w2.size + uwT.size + N * Co * Ho * Wo) * itemsize)

    kernel = functools.partial(_interp_conv_kernel, h_in=H, w_in=W, taps=_up2_taps(H))

    out_flat = pl.pallas_call(
        kernel,
        out_shape=jax.ShapeDtypeStruct((N, Co, Ho * Wo), dtype),
        grid_spec=pltpu.PrefetchScalarGridSpec(
            num_scalar_prefetch=0,
            grid=(N, n_co),
            in_specs=[
                pl.BlockSpec((pl.Squeezed(), Ci, H * W), lambda n, c: (n, 0, 0)),
                pl.BlockSpec((co_tile, Ci), lambda n, c: (c, 0)),
                pl.BlockSpec((W, Wo), lambda n, c: (0, 0)),
            ],
            out_specs=pl.BlockSpec((pl.Squeezed(), co_tile, Ho * Wo), lambda n, c: (n, c, 0)),
        ),
        compiler_params=pltpu.CompilerParams(
            dimension_semantics=("parallel", "parallel"),
            vmem_limit_bytes=vmem_limit,
        ),
        cost_estimate=pl.CostEstimate(
            flops=flops, transcendentals=0, bytes_accessed=bytes_accessed),
    )(x_flat, w2, uwT)

    return out_flat.reshape(N, Co, Ho, Wo)


if __name__ == "__main__":
    # TODO(synk): torch.utils.checkpoint only changes backward-pass memory; no forward-pass effect.
    key = jax.random.PRNGKey(0)
    kx, kw = jax.random.split(key)

    N, C_in, H, W = 2, 4, 16, 16
    C_out = 8

    x = jax.random.normal(kx, (N, C_in, H, W), dtype=jnp.float32)
    # Deterministic 1x1 conv weight (Conv2d weight shape (C_out, C_in, 1, 1) squeezed).
    w_conv = (jax.random.normal(kw, (C_out, C_in), dtype=jnp.float32)
              * (1.0 / jnp.sqrt(C_in)))

    out = interp_conv(x, w_conv)
    out = jax.block_until_ready(out)

    # Pure-JAX reference in the module's original order: bilinear x2 upsample, then 1x1 conv.
    uh = _bilinear_up2_matrix(H)
    uw = _bilinear_up2_matrix(W)
    up_ref = jnp.einsum('ph,nchw->ncpw', uh, x)
    up_ref = jnp.einsum('qw,ncpw->ncpq', uw, up_ref)
    ref = jnp.einsum('oc,ncpq->nopq', w_conv, up_ref)

    assert out.shape == (N, C_out, 2 * H, 2 * W), out.shape
    assert jnp.allclose(out, ref, atol=1e-4, rtol=1e-4), float(jnp.max(jnp.abs(out - ref)))

    print("KERNEL_OK")
</pallas_src>

<mosaic_0001>
module attributes {stable_mosaic.version = 11 : i64} {
  func.func @_interp_conv_kernel(%arg0: i32, %arg1: i32, %arg2: memref<1x4x256xf32, #tpu.memory_space<vmem>>, %arg3: memref<8x4xf32, #tpu.memory_space<vmem>>, %arg4: memref<16x32xf32, #tpu.memory_space<vmem>>, %arg5: memref<1x8x1024xf32, #tpu.memory_space<vmem>>) attributes {dimension_semantics = [#tpu.dimension_semantics<parallel>, #tpu.dimension_semantics<parallel>], iteration_bounds = array<i64: 2, 1>, scalar_prefetch = 0 : i64, scratch_operands = 0 : i64, tpu.core_type = #tpu.core_type<tc>, window_params = [{transform_indices = @transform_0, window_bounds = array<i64: 1, 4, 256>}, {transform_indices = @transform_1, window_bounds = array<i64: 8, 4>}, {pipeline_mode = #tpu.pipeline_mode<synchronous>, transform_indices = @transform_2, window_bounds = array<i64: 16, 32>}, {transform_indices = @transform_3, window_bounds = array<i64: 1, 8, 1024>}]} {
    %c0 = arith.constant 0 : index
    %c0_0 = arith.constant 0 : index
    %0 = vector.load %arg3[%c0, %c0_0] : memref<8x4xf32, #tpu.memory_space<vmem>>, vector<8x4xf32>
    %c0_1 = arith.constant 0 : index
    %c0_2 = arith.constant 0 : index
    %c0_3 = arith.constant 0 : index
    %1 = vector.load %arg2[%c0_1, %c0_2, %c0_3] : memref<1x4x256xf32, #tpu.memory_space<vmem>>, vector<1x4x256xf32>
    %2 = vector.shape_cast %1 : vector<1x4x256xf32> to vector<4x256xf32>
    %cst = arith.constant dense<0.000000e+00> : vector<8x256xf32>
    %3 = tpu.matmul %0, %2, %cst {dimension_numbers = #tpu.dot_dimension_numbers<[1], [0], [0], [1], [0, 0, 1, 1], [], []>} : vector<8x4xf32>, vector<4x256xf32>, vector<8x256xf32> -> vector<8x256xf32>
    %c0_4 = arith.constant 0 : index
    %c0_5 = arith.constant 0 : index
    %4 = vector.load %arg4[%c0_4, %c0_5] : memref<16x32xf32, #tpu.memory_space<vmem>>, vector<16x32xf32>
    %5 = vector.extract_strided_slice %3 {offsets = [0, 0], sizes = [8, 16], strides = [1, 1]} : vector<8x256xf32> to vector<8x16xf32>
    %cst_6 = arith.constant dense<0.000000e+00> : vector<8x32xf32>
    %6 = tpu.matmul %5, %4, %cst_6 {dimension_numbers = #tpu.dot_dimension_numbers<[1], [0], [0], [1], [0, 0, 1, 1], [], []>} : vector<8x16xf32>, vector<16x32xf32>, vector<8x32xf32> -> vector<8x32xf32>
    %7 = vector.extract_strided_slice %3 {offsets = [0, 16], sizes = [8, 16], strides = [1, 1]} : vector<8x256xf32> to vector<8x16xf32>
    %cst_7 = arith.constant dense<0.000000e+00> : vector<8x32xf32>
    %8 = tpu.matmul %7, %4, %cst_7 {dimension_numbers = #tpu.dot_dimension_numbers<[1], [0], [0], [1], [0, 0, 1, 1], [], []>} : vector<8x16xf32>, vector<16x32xf32>, vector<8x32xf32> -> vector<8x32xf32>
    %9 = vector.extract_strided_slice %3 {offsets = [0, 32], sizes = [8, 16], strides = [1, 1]} : vector<8x256xf32> to vector<8x16xf32>
    %cst_8 = arith.constant dense<0.000000e+00> : vector<8x32xf32>
    %10 = tpu.matmul %9, %4, %cst_8 {dimension_numbers = #tpu.dot_dimension_numbers<[1], [0], [0], [1], [0, 0, 1, 1], [], []>} : vector<8x16xf32>, vector<16x32xf32>, vector<8x32xf32> -> vector<8x32xf32>
    %11 = vector.extract_strided_slice %3 {offsets = [0, 48], sizes = [8, 16], strides = [1, 1]} : vector<8x256xf32> to vector<8x16xf32>
    %cst_9 = arith.constant dense<0.000000e+00> : vector<8x32xf32>
    %12 = tpu.matmul %11, %4, %cst_9 {dimension_numbers = #tpu.dot_dimension_numbers<[1], [0], [0], [1], [0, 0, 1, 1], [], []>} : vector<8x16xf32>, vector<16x32xf32>, vector<8x32xf32> -> vector<8x32xf32>
    %13 = vector.extract_strided_slice %3 {offsets = [0, 64], sizes = [8, 16], strides = [1, 1]} : vector<8x256xf32> to vector<8x16xf32>
    %cst_10 = arith.constant dense<0.000000e+00> : vector<8x32xf32>
    %14 = tpu.matmul %13, %4, %cst_10 {dimension_numbers = #tpu.dot_dimension_numbers<[1], [0], [0], [1], [0, 0, 1, 1], [], []>} : vector<8x16xf32>, vector<16x32xf32>, vector<8x32xf32> -> vector<8x32xf32>
    %15 = vector.extract_strided_slice %3 {offsets = [0, 80], sizes = [8, 16], strides = [1, 1]} : vector<8x256xf32> to vector<8x16xf32>
    %cst_11 = arith.constant dense<0.000000e+00> : vector<8x32xf32>
    %16 = tpu.matmul %15, %4, %cst_11 {dimension_numbers = #tpu.dot_dimension_numbers<[1], [0], [0], [1], [0, 0, 1, 1], [], []>} : vector<8x16xf32>, vector<16x32xf32>, vector<8x32xf32> -> vector<8x32xf32>
    %17 = vector.extract_strided_slice %3 {offsets = [0, 96], sizes = [8, 16], strides = [1, 1]} : vector<8x256xf32> to vector<8x16xf32>
    %cst_12 = arith.constant dense<0.000000e+00> : vector<8x32xf32>
    %18 = tpu.matmul %17, %4, %cst_12 {dimension_numbers = #tpu.dot_dimension_numbers<[1], [0], [0], [1], [0, 0, 1, 1], [], []>} : vector<8x16xf32>, vector<16x32xf32>, vector<8x32xf32> -> vector<8x32xf32>
    %19 = vector.extract_strided_slice %3 {offsets = [0, 112], sizes = [8, 16], strides = [1, 1]} : vector<8x256xf32> to vector<8x16xf32>
    %cst_13 = arith.constant dense<0.000000e+00> : vector<8x32xf32>
    %20 = tpu.matmul %19, %4, %cst_13 {dimension_numbers = #tpu.dot_dimension_numbers<[1], [0], [0], [1], [0, 0, 1, 1], [], []>} : vector<8x16xf32>, vector<16x32xf32>, vector<8x32xf32> -> vector<8x32xf32>
    %21 = vector.extract_strided_slice %3 {offsets = [0, 128], sizes = [8, 16], strides = [1, 1]} : vector<8x256xf32> to vector<8x16xf32>
    %cst_14 = arith.constant dense<0.000000e+00> : vector<8x32xf32>
    %22 = tpu.matmul %21, %4, %cst_14 {dimension_numbers = #tpu.dot_dimension_numbers<[1], [0], [0], [1], [0, 0, 1, 1], [], []>} : vector<8x16xf32>, vector<16x32xf32>, vector<8x32xf32> -> vector<8x32xf32>
    %23 = vector.extract_strided_slice %3 {offsets = [0, 144], sizes = [8, 16], strides = [1, 1]} : vector<8x256xf32> to vector<8x16xf32>
    %cst_15 = arith.constant dense<0.000000e+00> : vector<8x32xf32>
    %24 = tpu.matmul %23, %4, %cst_15 {dimension_numbers = #tpu.dot_dimension_numbers<[1], [0], [0], [1], [0, 0, 1, 1], [], []>} : vector<8x16xf32>, vector<16x32xf32>, vector<8x32xf32> -> vector<8x32xf32>
    %25 = vector.extract_strided_slice %3 {offsets = [0, 160], sizes = [8, 16], strides = [1, 1]} : vector<8x256xf32> to vector<8x16xf32>
    %cst_16 = arith.constant dense<0.000000e+00> : vector<8x32xf32>
    %26 = tpu.matmul %25, %4, %cst_16 {dimension_numbers = #tpu.dot_dimension_numbers<[1], [0], [0], [1], [0, 0, 1, 1], [], []>} : vector<8x16xf32>, vector<16x32xf32>, vector<8x32xf32> -> vector<8x32xf32>
    %27 = vector.extract_strided_slice %3 {offsets = [0, 176], sizes = [8, 16], strides = [1, 1]} : vector<8x256xf32> to vector<8x16xf32>
    %cst_17 = arith.constant dense<0.000000e+00> : vector<8x32xf32>
    %28 = tpu.matmul %27, %4, %cst_17 {dimension_numbers = #tpu.dot_dimension_numbers<[1], [0], [0], [1], [0, 0, 1, 1], [], []>} : vector<8x16xf32>, vector<16x32xf32>, vector<8x32xf32> -> vector<8x32xf32>
    %29 = vector.extract_strided_slice %3 {offsets = [0, 192], sizes = [8, 16], strides = [1, 1]} : vector<8x256xf32> to vector<8x16xf32>
    %cst_18 = arith.constant dense<0.000000e+00> : vector<8x32xf32>
    %30 = tpu.matmul %29, %4, %cst_18 {dimension_numbers = #tpu.dot_dimension_numbers<[1], [0], [0], [1], [0, 0, 1, 1], [], []>} : vector<8x16xf32>, vector<16x32xf32>, vector<8x32xf32> -> vector<8x32xf32>
    %31 = vector.extract_strided_slice %3 {offsets = [0, 208], sizes = [8, 16], strides = [1, 1]} : vector<8x256xf32> to vector<8x16xf32>
    %cst_19 = arith.constant dense<0.000000e+00> : vector<8x32xf32>
    %32 = tpu.matmul %31, %4, %cst_19 {dimension_numbers = #tpu.dot_dimension_numbers<[1], [0], [0], [1], [0, 0, 1, 1], [], []>} : vector<8x16xf32>, vector<16x32xf32>, vector<8x32xf32> -> vector<8x32xf32>
    %33 = vector.extract_strided_slice %3 {offsets = [0, 224], sizes = [8, 16], strides = [1, 1]} : vector<8x256xf32> to vector<8x16xf32>
    %cst_20 = arith.constant dense<0.000000e+00> : vector<8x32xf32>
    %34 = tpu.matmul %33, %4, %cst_20 {dimension_numbers = #tpu.dot_dimension_numbers<[1], [0], [0], [1], [0, 0, 1, 1], [], []>} : vector<8x16xf32>, vector<16x32xf32>, vector<8x32xf32> -> vector<8x32xf32>
    %35 = vector.extract_strided_slice %3 {offsets = [0, 240], sizes = [8, 16], strides = [1, 1]} : vector<8x256xf32> to vector<8x16xf32>
    %cst_21 = arith.constant dense<0.000000e+00> : vector<8x32xf32>
    %36 = tpu.matmul %35, %4, %cst_21 {dimension_numbers = #tpu.dot_dimension_numbers<[1], [0], [0], [1], [0, 0, 1, 1], [], []>} : vector<8x16xf32>, vector<16x32xf32>, vector<8x32xf32> -> vector<8x32xf32>
    %cst_22 = arith.constant 7.500000e-01 : f32
    %37 = vector.broadcast %cst_22 : f32 to vector<8x32xf32>
    %38 = arith.mulf %37, %6 : vector<8x32xf32>
    %cst_23 = arith.constant 2.500000e-01 : f32
    %39 = vector.broadcast %cst_23 : f32 to vector<8x32xf32>
    %40 = arith.mulf %39, %8 : vector<8x32xf32>
    %41 = arith.addf %38, %40 : vector<8x32xf32>
    %cst_24 = arith.constant 2.500000e-01 : f32
    %42 = vector.broadcast %cst_24 : f32 to vector<8x32xf32>
    %43 = arith.mulf %42, %6 : vector<8x32xf32>
    %cst_25 = arith.constant 7.500000e-01 : f32
    %44 = vector.broadcast %cst_25 : f32 to vector<8x32xf32>
    %45 = arith.mulf %44, %8 : vector<8x32xf32>
    %46 = arith.addf %43, %45 : vector<8x32xf32>
    %cst_26 = arith.constant 7.500000e-01 : f32
    %47 = vector.broadcast %cst_26 : f32 to vector<8x32xf32>
    %48 = arith.mulf %47, %8 : vector<8x32xf32>
    %cst_27 = arith.constant 2.500000e-01 : f32
    %49 = vector.broadcast %cst_27 : f32 to vector<8x32xf32>
    %50 = arith.mulf %49, %10 : vector<8x32xf32>
    %51 = arith.addf %48, %50 : vector<8x32xf32>
    %cst_28 = arith.constant 2.500000e-01 : f32
    %52 = vector.broadcast %cst_28 : f32 to vector<8x32xf32>
    %53 = arith.mulf %52, %8 : vector<8x32xf32>
    %cst_29 = arith.constant 7.500000e-01 : f32
    %54 = vector.broadcast %cst_29 : f32 to vector<8x32xf32>
    %55 = arith.mulf %54, %10 : vector<8x32xf32>
    %56 = arith.addf %53, %55 : vector<8x32xf32>
    %cst_30 = arith.constant 7.500000e-01 : f32
    %57 = vector.broadcast %cst_30 : f32 to vector<8x32xf32>
    %58 = arith.mulf %57, %10 : vector<8x32xf32>
    %cst_31 = arith.constant 2.500000e-01 : f32
    %59 = vector.broadcast %cst_31 : f32 to vector<8x32xf32>
    %60 = arith.mulf %59, %12 : vector<8x32xf32>
    %61 = arith.addf %58, %60 : vector<8x32xf32>
    %cst_32 = arith.constant 2.500000e-01 : f32
    %62 = vector.broadcast %cst_32 : f32 to vector<8x32xf32>
    %63 = arith.mulf %62, %10 : vector<8x32xf32>
    %cst_33 = arith.constant 7.500000e-01 : f32
    %64 = vector.broadcast %cst_33 : f32 to vector<8x32xf32>
    %65 = arith.mulf %64, %12 : vector<8x32xf32>
    %66 = arith.addf %63, %65 : vector<8x32xf32>
    %cst_34 = arith.constant 7.500000e-01 : f32
    %67 = vector.broadcast %cst_34 : f32 to vector<8x32xf32>
    %68 = arith.mulf %67, %12 : vector<8x32xf32>
    %cst_35 = arith.constant 2.500000e-01 : f32
    %69 = vector.broadcast %cst_35 : f32 to vector<8x32xf32>
    %70 = arith.mulf %69, %14 : vector<8x32xf32>
    %71 = arith.addf %68, %70 : vector<8x32xf32>
    %cst_36 = arith.constant 2.500000e-01 : f32
    %72 = vector.broadcast %cst_36 : f32 to vector<8x32xf32>
    %73 = arith.mulf %72, %12 : vector<8x32xf32>
    %cst_37 = arith.constant 7.500000e-01 : f32
    %74 = vector.broadcast %cst_37 : f32 to vector<8x32xf32>
    %75 = arith.mulf %74, %14 : vector<8x32xf32>
    %76 = arith.addf %73, %75 : vector<8x32xf32>
    %cst_38 = arith.constant 7.500000e-01 : f32
    %77 = vector.broadcast %cst_38 : f32 to vector<8x32xf32>
    %78 = arith.mulf %77, %14 : vector<8x32xf32>
    %cst_39 = arith.constant 2.500000e-01 : f32
    %79 = vector.broadcast %cst_39 : f32 to vector<8x32xf32>
    %80 = arith.mulf %79, %16 : vector<8x32xf32>
    %81 = arith.addf %78, %80 : vector<8x32xf32>
    %cst_40 = arith.constant 2.500000e-01 : f32
    %82 = vector.broadcast %cst_40 : f32 to vector<8x32xf32>
    %83 = arith.mulf %82, %14 : vector<8x32xf32>
    %cst_41 = arith.constant 7.500000e-01 : f32
    %84 = vector.broadcast %cst_41 : f32 to vector<8x32xf32>
    %85 = arith.mulf %84, %16 : vector<8x32xf32>
    %86 = arith.addf %83, %85 : vector<8x32xf32>
    %cst_42 = arith.constant 7.500000e-01 : f32
    %87 = vector.broadcast %cst_42 : f32 to vector<8x32xf32>
    %88 = arith.mulf %87, %16 : vector<8x32xf32>
    %cst_43 = arith.constant 2.500000e-01 : f32
    %89 = vector.broadcast %cst_43 : f32 to vector<8x32xf32>
    %90 = arith.mulf %89, %18 : vector<8x32xf32>
    %91 = arith.addf %88, %90 : vector<8x32xf32>
    %cst_44 = arith.constant 2.500000e-01 : f32
    %92 = vector.broadcast %cst_44 : f32 to vector<8x32xf32>
    %93 = arith.mulf %92, %16 : vector<8x32xf32>
    %cst_45 = arith.constant 7.500000e-01 : f32
    %94 = vector.broadcast %cst_45 : f32 to vector<8x32xf32>
    %95 = arith.mulf %94, %18 : vector<8x32xf32>
    %96 = arith.addf %93, %95 : vector<8x32xf32>
    %cst_46 = arith.constant 7.500000e-01 : f32
    %97 = vector.broadcast %cst_46 : f32 to vector<8x32xf32>
    %98 = arith.mulf %97, %18 : vector<8x32xf32>
    %cst_47 = arith.constant 2.500000e-01 : f32
    %99 = vector.broadcast %cst_47 : f32 to vector<8x32xf32>
    %100 = arith.mulf %99, %20 : vector<8x32xf32>
    %101 = arith.addf %98, %100 : vector<8x32xf32>
    %cst_48 = arith.constant 2.500000e-01 : f32
    %102 = vector.broadcast %cst_48 : f32 to vector<8x32xf32>
    %103 = arith.mulf %102, %18 : vector<8x32xf32>
    %cst_49 = arith.constant 7.500000e-01 : f32
    %104 = vector.broadcast %cst_49 : f32 to vector<8x32xf32>
    %105 = arith.mulf %104, %20 : vector<8x32xf32>
    %106 = arith.addf %103, %105 : vector<8x32xf32>
    %cst_50 = arith.constant 7.500000e-01 : f32
    %107 = vector.broadcast %cst_50 : f32 to vector<8x32xf32>
    %108 = arith.mulf %107, %20 : vector<8x32xf32>
    %cst_51 = arith.constant 2.500000e-01 : f32
    %109 = vector.broadcast %cst_51 : f32 to vector<8x32xf32>
    %110 = arith.mulf %109, %22 : vector<8x32xf32>
    %111 = arith.addf %108, %110 : vector<8x32xf32>
    %cst_52 = arith.constant 2.500000e-01 : f32
    %112 = vector.broadcast %cst_52 : f32 to vector<8x32xf32>
    %113 = arith.mulf %112, %20 : vector<8x32xf32>
    %cst_53 = arith.constant 7.500000e-01 : f32
    %114 = vector.broadcast %cst_53 : f32 to vector<8x32xf32>
    %115 = arith.mulf %114, %22 : vector<8x32xf32>
    %116 = arith.addf %113, %115 : vector<8x32xf32>
    %cst_54 = arith.constant 7.500000e-01 : f32
    %117 = vector.broadcast %cst_54 : f32 to vector<8x32xf32>
    %118 = arith.mulf %117, %22 : vector<8x32xf32>
    %cst_55 = arith.constant 2.500000e-01 : f32
    %119 = vector.broadcast %cst_55 : f32 to vector<8x32xf32>
    %120 = arith.mulf %119, %24 : vector<8x32xf32>
    %121 = arith.addf %118, %120 : vector<8x32xf32>
    %cst_56 = arith.constant 2.500000e-01 : f32
    %122 = vector.broadcast %cst_56 : f32 to vector<8x32xf32>
    %123 = arith.mulf %122, %22 : vector<8x32xf32>
    %cst_57 = arith.constant 7.500000e-01 : f32
    %124 = vector.broadcast %cst_57 : f32 to vector<8x32xf32>
    %125 = arith.mulf %124, %24 : vector<8x32xf32>
    %126 = arith.addf %123, %125 : vector<8x32xf32>
    %cst_58 = arith.constant 7.500000e-01 : f32
    %127 = vector.broadcast %cst_58 : f32 to vector<8x32xf32>
    %128 = arith.mulf %127, %24 : vector<8x32xf32>
    %cst_59 = arith.constant 2.500000e-01 : f32
    %129 = vector.broadcast %cst_59 : f32 to vector<8x32xf32>
    %130 = arith.mulf %129, %26 : vector<8x32xf32>
    %131 = arith.addf %128, %130 : vector<8x32xf32>
    %cst_60 = arith.constant 2.500000e-01 : f32
    %132 = vector.broadcast %cst_60 : f32 to vector<8x32xf32>
    %133 = arith.mulf %132, %24 : vector<8x32xf32>
    %cst_61 = arith.constant 7.500000e-01 : f32
    %134 = vector.broadcast %cst_61 : f32 to vector<8x32xf32>
    %135 = arith.mulf %134, %26 : vector<8x32xf32>
    %136 = arith.addf %133, %135 : vector<8x32xf32>
    %cst_62 = arith.constant 7.500000e-01 : f32
    %137 = vector.broadcast %cst_62 : f32 to vector<8x32xf32>
    %138 = arith.mulf %137, %26 : vector<8x32xf32>
    %cst_63 = arith.constant 2.500000e-01 : f32
    %139 = vector.broadcast %cst_63 : f32 to vector<8x32xf32>
    %140 = arith.mulf %139, %28 : vector<8x32xf32>
    %141 = arith.addf %138, %140 : vector<8x32xf32>
    %cst_64 = arith.constant 2.500000e-01 : f32
    %142 = vector.broadcast %cst_64 : f32 to vector<8x32xf32>
    %143 = arith.mulf %142, %26 : vector<8x32xf32>
    %cst_65 = arith.constant 7.500000e-01 : f32
    %144 = vector.broadcast %cst_65 : f32 to vector<8x32xf32>
    %145 = arith.mulf %144, %28 : vector<8x32xf32>
    %146 = arith.addf %143, %145 : vector<8x32xf32>
    %cst_66 = arith.constant 7.500000e-01 : f32
    %147 = vector.broadcast %cst_66 : f32 to vector<8x32xf32>
    %148 = arith.mulf %147, %28 : vector<8x32xf32>
    %cst_67 = arith.constant 2.500000e-01 : f32
    %149 = vector.broadcast %cst_67 : f32 to vector<8x32xf32>
    %150 = arith.mulf %149, %30 : vector<8x32xf32>
    %151 = arith.addf %148, %150 : vector<8x32xf32>
    %cst_68 = arith.constant 2.500000e-01 : f32
    %152 = vector.broadcast %cst_68 : f32 to vector<8x32xf32>
    %153 = arith.mulf %152, %28 : vector<8x32xf32>
    %cst_69 = arith.constant 7.500000e-01 : f32
    %154 = vector.broadcast %cst_69 : f32 to vector<8x32xf32>
    %155 = arith.mulf %154, %30 : vector<8x32xf32>
    %156 = arith.addf %153, %155 : vector<8x32xf32>
    %cst_70 = arith.constant 7.500000e-01 : f32
    %157 = vector.broadcast %cst_70 : f32 to vector<8x32xf32>
    %158 = arith.mulf %157, %30 : vector<8x32xf32>
    %cst_71 = arith.constant 2.500000e-01 : f32
    %159 = vector.broadcast %cst_71 : f32 to vector<8x32xf32>
    %160 = arith.mulf %159, %32 : vector<8x32xf32>
    %161 = arith.addf %158, %160 : vector<8x32xf32>
    %cst_72 = arith.constant 2.500000e-01 : f32
    %162 = vector.broadcast %cst_72 : f32 to vector<8x32xf32>
    %163 = arith.mulf %162, %30 : vector<8x32xf32>
    %cst_73 = arith.constant 7.500000e-01 : f32
    %164 = vector.broadcast %cst_73 : f32 to vector<8x32xf32>
    %165 = arith.mulf %164, %32 : vector<8x32xf32>
    %166 = arith.addf %163, %165 : vector<8x32xf32>
    %cst_74 = arith.constant 7.500000e-01 : f32
    %167 = vector.broadcast %cst_74 : f32 to vector<8x32xf32>
    %168 = arith.mulf %167, %32 : vector<8x32xf32>
    %cst_75 = arith.constant 2.500000e-01 : f32
    %169 = vector.broadcast %cst_75 : f32 to vector<8x32xf32>
    %170 = arith.mulf %169, %34 : vector<8x32xf32>
    %171 = arith.addf %168, %170 : vector<8x32xf32>
    %cst_76 = arith.constant 2.500000e-01 : f32
    %172 = vector.broadcast %cst_76 : f32 to vector<8x32xf32>
    %173 = arith.mulf %172, %32 : vector<8x32xf32>
    %cst_77 = arith.constant 7.500000e-01 : f32
    %174 = vector.broadcast %cst_77 : f32 to vector<8x32xf32>
    %175 = arith.mulf %174, %34 : vector<8x32xf32>
    %176 = arith.addf %173, %175 : vector<8x32xf32>
    %cst_78 = arith.constant 7.500000e-01 : f32
    %177 = vector.broadcast %cst_78 : f32 to vector<8x32xf32>
    %178 = arith.mulf %177, %34 : vector<8x32xf32>
    %cst_79 = arith.constant 2.500000e-01 : f32
    %179 = vector.broadcast %cst_79 : f32 to vector<8x32xf32>
    %180 = arith.mulf %179, %36 : vector<8x32xf32>
    %181 = arith.addf %178, %180 : vector<8x32xf32>
    %cst_80 = arith.constant 2.500000e-01 : f32
    %182 = vector.broadcast %cst_80 : f32 to vector<8x32xf32>
    %183 = arith.mulf %182, %34 : vector<8x32xf32>
    %cst_81 = arith.constant 7.500000e-01 : f32
    %184 = vector.broadcast %cst_81 : f32 to vector<8x32xf32>
    %185 = arith.mulf %184, %36 : vector<8x32xf32>
    %186 = arith.addf %183, %185 : vector<8x32xf32>
    %187 = tpu.concatenate %6, %41, %46, %51, %56, %61, %66, %71, %76, %81, %86, %91, %96, %101, %106, %111 in 1 : vector<8x32xf32>, vector<8x32xf32>, vector<8x32xf32>, vector<8x32xf32>, vector<8x32xf32>, vector<8x32xf32>, vector<8x32xf32>, vector<8x32xf32>, vector<8x32xf32>, vector<8x32xf32>, vector<8x32xf32>, vector<8x32xf32>, vector<8x32xf32>, vector<8x32xf32>, vector<8x32xf32>, vector<8x32xf32> -> vector<8x512xf32>
    %188 = tpu.concatenate %116, %121, %126, %131, %136, %141, %146, %151, %156, %161, %166, %171, %176, %181, %186, %36 in 1 : vector<8x32xf32>, vector<8x32xf32>, vector<8x32xf32>, vector<8x32xf32>, vector<8x32xf32>, vector<8x32xf32>, vector<8x32xf32>, vector<8x32xf32>, vector<8x32xf32>, vector<8x32xf32>, vector<8x32xf32>, vector<8x32xf32>, vector<8x32xf32>, vector<8x32xf32>, vector<8x32xf32>, vector<8x32xf32> -> vector<8x512xf32>
    %189 = tpu.concatenate %187, %188 in 1 : vector<8x512xf32>, vector<8x512xf32> -> vector<8x1024xf32>
    %c0_82 = arith.constant 0 : index
    %c0_83 = arith.constant 0 : index
    %c0_84 = arith.constant 0 : index
    %190 = vector.load %arg5[%c0_82, %c0_83, %c0_84] : memref<1x8x1024xf32, #tpu.memory_space<vmem>>, vector<1x8x1024xf32>
    %191 = vector.shape_cast %190 : vector<1x8x1024xf32> to vector<8x1024xf32>
    %192 = vector.shape_cast %189 : vector<8x1024xf32> to vector<1x8x1024xf32>
    tpu.vector_store %arg5[%c0_82, %c0_83, %c0_84], %192 {strides = array<i32>} : memref<1x8x1024xf32, #tpu.memory_space<vmem>>, vector<1x8x1024xf32>,
    return
  }
  func.func @transform_0(%arg0: i32, %arg1: i32) -> (i32, i32, i32) {
    %c0_i32 = arith.constant 0 : i32
    %c0_i32_0 = arith.constant 0 : i32
    %c0_i32_1 = arith.constant 0 : i32
    return %arg0, %c0_i32, %c0_i32_0 : i32, i32, i32
  }
  func.func @transform_1(%arg0: i32, %arg1: i32) -> (i32, i32) {
    %c0_i32 = arith.constant 0 : i32
    %c0_i32_0 = arith.constant 0 : i32
    return %arg1, %c0_i32 : i32, i32
  }
  func.func @transform_2(%arg0: i32, %arg1: i32) -> (i32, i32) {
    %c0_i32 = arith.constant 0 : i32
    %c0_i32_0 = arith.constant 0 : i32
    %c0_i32_1 = arith.constant 0 : i32
    return %c0_i32, %c0_i32_0 : i32, i32
  }
  func.func @transform_3(%arg0: i32, %arg1: i32) -> (i32, i32, i32) {
    %c0_i32 = arith.constant 0 : i32
    %c0_i32_0 = arith.constant 0 : i32
    return %arg0, %arg1, %c0_i32 : i32, i32, i32
  }
}

</mosaic_0001>

<bundles_post_ra>
// kernel: tpu_custom_call.1
= control target key start
LH: loop header
LB: loop body
LE: loop exit
PB: predicated region body
PF: predicated region fallthrough
CT: control target
= control target key end

     0   :  { %8 = vsyncpa [#allocation3], 0  ;;  %s2613_s0 = inlined_call_operand.hbm [shape: f32[2,4,256], index: 0, kind: input, shape index: {}]   ;;  %s2614_s1 = inlined_call_operand.vmem [shape: f32[8,4], index: 1, kind: input, shape index: {}]   ;;  %s2615_s2 = inlined_call_operand.vmem [shape: f32[16,32], index: 2, kind: input, shape index: {}]   ;;  %s2616_s3 = inlined_call_operand.hbm [shape: f32[2,8,1024], index: 3, kind: output, shape index: {}]  }
   0x1   :  { %10 = vsyncpa [#allocation3 + $0x1], 0 }
   0x2   :  { %11 = vsyncpa [#allocation4], 0 }
   0x3   :  { %13 = vsyncpa [#allocation4 + $0x1], 0  ;;  %s2257_s12 = smov 0   ;;  %s2259_s13 = smov 0  }
   0x4   :  { %s2261_s14 = smov 0   ;;  %s2263_s15 = smov 0  }
   0x5   :  { %s2265_s16 = smov 0   ;;  %s2267_s17 = smov 0  }
   0x6 LB: > { %s1793_s18 = sadd.s32 4294967295, %s2223_s17   ;;  %s1794_s19 = sadd.s32 4294967294, %s2223_s17   ;;  %s2223_s17 = sphi %s2267_s17, %s19_s17   ;;  %s2219_s16 = sphi %s2265_s16, %s2632_s16   ;;  %s2215_s15 = sphi %s2263_s15, %s2631_s15   ;;  %s2211_s14 = sphi %s2261_s14, %s2630_s14   ;;  %s2207_s13 = sphi %s2259_s13, %s2629_s13   ;;  %s2203_s12 = sphi %s2257_s12, %s2628_s12  }
   0x7   : > { %s31_s20 = sadd.s32 1, %s2219_s16  ;;  %s38_s21 = sadd.s32 1, %s2211_s14 }
   0x8   : > { %p33_p0 = scmp.ge.s32.totalorder %s31_s20, 2  ;;  %p45_p1 = scmp.ne.s32.totalorder %s2211_s14, %s2207_s13 }
   0x9   : > { %p46_p2 = scmp.eq.s32.totalorder %s2223_s17, 0  ;;  %p51_p3 = scmp.ne.s32.totalorder %s2207_s13, %s2203_s12 }
   0xa   : > { %s2634_s20 = smov (%p33_p0, %s31_s20), 0  ;;  %p52_p5 = scmp.eq.s32.totalorder %s1793_s18, 0 }
   0xb   : > { %p2298_p4 = por %p46_p2, %p45_p1  ;;  %s35_s23 = ssub.s32 %s2219_s16, %s2634_s20 }
   0xc   : > { %p124_p6 = scmp.eq.s32.totalorder %s1793_s18, 1  ;;  %p36_p7 = scmp.eq.s32.totalorder %s35_s23, 0 }
   0xd   : > { %p2304_p8 = por %p52_p5, %p51_p3  ;;  %p130_p10 = scmp.eq.s32.totalorder %s1794_s19, 1 }
   0xe   : > { %p2308_p9 = por %p124_p6, %p45_p1  ;;  %p2050_p13 = scmp.lt.s32.totalorder %s2223_s17, 2 }
   0xf   : > { %s2313_s26 = scalar_select %p36_p7, %s2211_s14, %s38_s21  }
  0x10   : > { %s2620_s25 = scalar_select %p2308_p9, 1, 0 }
  0x11   : > { %p2315_p11 = por %p130_p10, %p51_p3  ;;  %s160_s28 = sand.u32 1, %s2211_s14  }
  0x12   : > { %s1798_s29 = sshll.u32 %s160_s28, 3  ;;  %s1828_s30 = sshll.u32 %s2219_s16, 7 }
  0x13   : > { %s2621_s27 = scalar_select %p2315_p11, 1, 0 }
  0x14   : > { %s2326_s6 = scalar_lea.hbm %s2613_s0, %s1828_s30  ;;  %s164_s7 = scalar_lea.vmem [#allocation2], %s1798_s29 }
  0x15   : > { %s172_s8 = sshll.u32 %s164_s7, 4  ;;  %p2332_p0 = pnand %p2050_p13, %p2298_p4  ;;  %s2328_s8 = int_to_ptr.vmem [resolvable:$true] %s172_s8 }
  0x16   : > { %s161_s10 = scalar_lea.sflag [#allocation3], %s160_s28  ;;  %s2111_s11 = scalar_lea.hbm %s2326_s6, 128 }
  0x17   : > { %p2112_p3 = scmp.ne.s32.totalorder %s2326_s6, %s2111_s11  ;;  %p2113_p5 = pneg %p2332_p0 }
  0x18   : > { %s2116_s21 = scalar_lea.hbm %s2613_s0, 256  ;;  %p2117_p4 = scmp.lt.u32.totalorder %s2326_s6, %s2613_s0 }
  0x19   : > { %p2114_p6 = pnand %p2113_p5, %p2112_p3  ;;  %p2118_p10 = scmp.lt.u32.totalorder %s2116_s21, %s2111_s11 }
  0x1a   : > { %p2120_p12 = scmp.lt.u32.totalorder %s2111_s11, %s2326_s6 }
  0x1b   : > { %p2115_p7 = pneg %p2114_p6  ;;  %p2119_p13 = por %p2118_p10, %p2117_p4 }
  0x1d   : > { %p2121_p1 = por %p2120_p12, %p2119_p13 }
  0x1f   : > { %p2122_p2 = pnand %p2121_p1, %p2115_p7 }
  0x21   : > { %2125 = shalt.err (!%p2122_p2)
}
  0x22   : > { %s2126_s28 = scalar_lea.vmem %s2328_s8, 128  ;;  %s2225_s29 = smov [#allocation2]  }
  0x23   : > { %p2127_p3 = scmp.ne.s32.totalorder %s2328_s8, %s2126_s28  ;;  %s2131_s30 = sshll.u32 %s2225_s29, 4  ;;  %s2132_s30 = int_to_ptr.vmem [resolvable:$false] %s2131_s30 }
  0x24   : > { %s2133_s4 = scalar_lea.vmem %s2132_s30, 256  ;;  %p2134_p9 = scmp.lt.s32.totalorder %s2328_s8, %s2132_s30 }
  0x25   : > { %p2129_p6 = pnand %p2127_p3, %p2113_p5  ;;  %p2135_p4 = scmp.lt.s32.totalorder %s2133_s4, %s2126_s28 }
  0x27   : > { %p2130_p11 = pneg %p2129_p6  ;;  %p2136_p10 = por %p2135_p4, %p2134_p9 }
  0x29   : > { %p2137_p12 = pnand %p2136_p10, %p2130_p11 }
  0x2b   : > { %2140 = shalt.err (!%p2137_p12)
}
  0x2c   : > { %2045 = dma.hbm_to_vmem [thread:$0]  (!%p2332_p0), %s2326_s6, 128, %s2328_s8, %s161_s10  }
  0x2d   : > { %p2623_p1 = scmp.lt.s32.totalorder %s2223_s17, 3  ;;  %p2624_p2 = scmp.ge.s32.totalorder %s2223_s17, 1 }
  0x2f   : > { %p178_p5 = pnand %p2624_p2, %p2623_p1 }
  0x30   : > { %s2368_s5 = sand.u32 (!%p178_p5), 1, %s2207_s13  }
  0x31   : > { %181 = sbr.rel (%p178_p5) target bundleno = 783 (0x30f), region = 32  ;;  %s1802_s7 = sshll.u32 (!%p178_p5), %s2368_s5, 3 }
  0x32   : > { %s184_s11 = scalar_lea.sflag (!%p178_p5), [#allocation3], %s2368_s5  ;;  %s187_s18 = scalar_lea.vmem (!%p178_p5), [#allocation2], %s1802_s7 }
  0x38   : > { %2194 = dma.done.wait (%p2304_p8), %s184_s11, 128  }
  0x39   : > { %2196 = vsyncadd (%p2304_p8), %s184_s11, 4294967168  ;;  %v2226_v0 = vmov 0.0   ;;  %v2227_v1 = vmov 0.0|0.0   ;;  %v219_v2 = vld [vmem:[%s187_s18] sm:$0xff]  ;;  %vm226_vm0 = vcmask 1043456   ;;  %vm222_vm1 = vcmask 31744  }
  0x3a   : > { %295 = vmatprep.mubr.f32.mxu0 %v2226_v0  ;;  %1990 = vmatprep.subr.bf16.mxu1 %v2227_v1  ;;  %v302_v3 = vld [vmem:[%s2615_s2] sm:$0xff]  ;;  %v221_v4 = vcombine.high %v219_v2, %v219_v2  ;;  %v303_v5 = vld [vmem:[%s2615_s2 + $0x8] sm:$0xff]  ;;  %vm2228_vm2 = vmmov 0   ;;  %vm304_vm3 = vcmask 130048   ;;  %s2229_s21 = smov 80   ;;  %s2230_s22 = smov 112  }
  0x3b   : > { %v218_v6 = vld [vmem:[%s2614_s1] sm:$0xff]  ;;  %v2387_v7 = vpack.c.bf16 %v303_v5, %v302_v3  ;;  %1882 = vmatprep.mubr.msk.f32.mxu1 %vm2228_vm2, %v2226_v0  ;;  %s2231_s23 = smov 64   ;;  %s2232_s28 = smov 96   ;;  %vm1597_vm4 = vcmask 261120   ;;  %vm1599_vm5 = vcmask 523264   ;;  %vm1601_vm6 = vcmask 785408  }
  0x3c   : > { %1804 = vmatprep.subr.msk.mxu0 %vm226_vm0, %v221_v4  ;;  %s2233_s29 = smov 32   ;;  %s2234_s30 = smov 48  }
  0x3d   : > { %1805 = vmatpush1.msk.msra.mxu0 %vm226_vm0, %v219_v2  ;;  %1992 = vmatpush3.bf16.msra.mxu1 %v2387_v7  ;;  %s2235_s4 = smov 16   ;;  %s1803_s7 = sshll.u32 %s2368_s5, 6 }
  0x3e   : > { %1806 = vmatmul.mubr.msk.f32.vlgmr.msra.gmra.mrb[0].mxu0 %vm222_vm1, %v218_v6  ;;  %1993 = vmatprep.subr.bf16.mxu0 %v2227_v1  ;;  %s2521_s11 = scalar_lea.vmem [#allocation5], %s1803_s7  ;;  %s1829_s18 = sshll.u32 %s2215_s15, 10 }
  0x3f   : > { %1995 = vmatpush3.bf16.msra.mxu0 %v2387_v7  ;;  %1996 = vmatprep.subr.bf16.mxu1 %v2227_v1  ;;  %s1697_s6 = sshll.u32 %s2521_s11, 4  ;;  %s2562_s10 = scalar_lea.hbm %s2616_s3, %s1829_s18  ;;  %s2564_s6 = int_to_ptr.vmem [resolvable:$true] %s1697_s6 }
  0x40   : > { %1999 = vmatprep.subr.bf16.mxu0 %v2227_v1  ;;  %1889 = vmatprep.mubr.msk.f32.mxu0 %vm2228_vm2, %v2226_v0  ;;  %s1681_s15 = scalar_lea.sflag [#allocation4], %s2368_s5  ;;  %s2141_s19 = scalar_lea.vmem %s2564_s6, 1024 }
  0x41   : > { %p2142_p8 = scmp.ne.s32.totalorder %s2564_s6, %s2141_s19  ;;  %p2625_p9 = scmp.ne.s32.totalorder %s2620_s25, 0 }
  0x42   : > { %s2236_s24 = smov [#allocation5]  }
  0x43   : > { %p2143_p11 = pnand %p2142_p8, %p2625_p9 }
  0x45   : > { %p2144_p0 = pneg %p2143_p11 }
 0x111   : > { %v297_v8 = vpop.f32.mrb[0].mxu0 }
 0x112   : > { %526 = vrot.lane.b32.xlu1 %v297_v8, %s2229_s21  ;;  %378 = vrot.lane.b32.xlu0 %v297_v8, %s2230_s22  ;;  %v299_v9 = vpop.f32.mrb[1].mxu0 }
 0x113   : > { %1883 = vmatmul.mubr.msk.f32.vlgmr.msra.gmra.mrb[0].mxu1 %vm304_vm3, %v297_v8 }
 0x114   : > { %1998 = vmatpush3.bf16.msra.mxu1 %v2387_v7  ;;  %1896 = vmatprep.mubr.msk.f32.mxu1 %vm2228_vm2, %v2226_v0 }
 0x115   : > { %2002 = vmatprep.subr.bf16.mxu1 %v2227_v1 }
 0x116   : > { %600 = vrot.lane.b32.xlu1 %v297_v8, %s2231_s23  ;;  %452 = vrot.lane.b32.xlu0 %v297_v8, %s2232_s28 }
 0x11a   : > { %748 = vrot.lane.b32.xlu1 %v297_v8, %s2233_s29  ;;  %674 = vrot.lane.b32.xlu0 %v297_v8, %s2234_s30 }
 0x11e   : > { %822 = vrot.lane.b32.xlu0 %v297_v8, %s2235_s4  ;;  %969 = vrot.lane.b32.xlu1 %v299_v9, %s2230_s22 }
 0x122   : > { %1043 = vrot.lane.b32.xlu0 %v299_v9, %s2232_s28  ;;  %1117 = vrot.lane.b32.xlu1 %v299_v9, %s2229_s21  ;;  %s2145_s21 = sshll.u32 %s2236_s24, 4  ;;  %s2146_s21 = int_to_ptr.vmem [resolvable:$false] %s2145_s21 }
 0x123   : > { %s2147_s22 = scalar_lea.vmem %s2146_s21, 2048  ;;  %p2148_p7 = scmp.lt.s32.totalorder %s2564_s6, %s2146_s21 }
 0x124   : > { %p2149_p13 = scmp.lt.s32.totalorder %s2147_s22, %s2141_s19 }
 0x126   : > { %1191 = vrot.lane.b32.xlu0 %v299_v9, %s2231_s23  ;;  %1265 = vrot.lane.b32.xlu1 %v299_v9, %s2234_s30  ;;  %p2150_p3 = por %p2149_p13, %p2148_p7 }
 0x128   : > { %p2151_p6 = pnand %p2150_p3, %p2144_p0 }
 0x12a   : > { %1339 = vrot.lane.b32.xlu0 %v299_v9, %s2233_s29  ;;  %1413 = vrot.lane.b32.xlu1 %v299_v9, %s2235_s4 }
 0x184   : > { %v527_v10 = vpop.permute.xlu1 %526  ;;  %v379_v11 = vpop.permute.xlu0 %378 }
 0x185   : > { %1890 = vmatmul.mubr.msk.f32.vlgmr.msra.gmra.mrb[2].mxu0 %vm304_vm3, %v379_v11 }
 0x186   : > { %2001 = vmatpush3.bf16.msra.mxu0 %v2387_v7  ;;  %1903 = vmatprep.mubr.msk.f32.mxu0 %vm2228_vm2, %v2226_v0 }
 0x187   : > { %2005 = vmatprep.subr.bf16.mxu0 %v2227_v1 }
 0x188   : > { %v601_v12 = vpop.permute.xlu1 %600  ;;  %v453_v13 = vpop.permute.xlu0 %452 }
 0x189   : > { %1897 = vmatmul.mubr.msk.f32.vlgmr.msra.gmra.mrb[2].mxu1 %vm304_vm3, %v453_v13  ;;  %1904 = vmatmul.mubr.msk.f32.vlgmr.msra.gmra.mrb[4].mxu0 %vm304_vm3, %v527_v10 }
 0x18a   : > { %2004 = vmatpush3.bf16.msra.mxu1 %v2387_v7  ;;  %2007 = vmatpush3.bf16.msra.mxu0 %v2387_v7 }
 0x18b   : > { %1917 = vmatprep.mubr.msk.f32.mxu0 %vm2228_vm2, %v2226_v0  ;;  %1910 = vmatprep.mubr.msk.f32.mxu1 %vm2228_vm2, %v2226_v0 }
 0x18c   : > { %v749_v14 = vpop.permute.xlu1 %748  ;;  %v675_v15 = vpop.permute.xlu0 %674  ;;  %2008 = vmatprep.subr.bf16.mxu1 %v2227_v1  ;;  %2011 = vmatprep.subr.bf16.mxu0 %v2227_v1 }
 0x18d   : > { %1911 = vmatmul.mubr.msk.f32.vlgmr.msra.gmra.mrb[4].mxu1 %vm304_vm3, %v601_v12  ;;  %1918 = vmatmul.mubr.msk.f32.vlgmr.msra.gmra.mrb[6].mxu0 %vm304_vm3, %v675_v15 }
 0x18e   : > { %2010 = vmatpush3.bf16.msra.mxu1 %v2387_v7  ;;  %2013 = vmatpush3.bf16.msra.mxu0 %v2387_v7 }
 0x18f   : > { %1931 = vmatprep.mubr.msk.f32.mxu0 %vm2228_vm2, %v2226_v0  ;;  %1924 = vmatprep.mubr.msk.f32.mxu1 %vm2228_vm2, %v2226_v0 }
 0x190   : > { %v823_v16 = vpop.permute.xlu0 %822  ;;  %v970_v17 = vpop.permute.xlu1 %969  ;;  %2014 = vmatprep.subr.bf16.mxu1 %v2227_v1  ;;  %2017 = vmatprep.subr.bf16.mxu0 %v2227_v1 }
 0x191   : > { %1925 = vmatmul.mubr.msk.f32.vlgmr.msra.gmra.mrb[6].mxu1 %vm304_vm3, %v749_v14  ;;  %1932 = vmatmul.mubr.msk.f32.vlgmr.msra.gmra.mrb[8].mxu0 %vm304_vm3, %v823_v16 }
 0x192   : > { %2016 = vmatpush3.bf16.msra.mxu1 %v2387_v7  ;;  %2019 = vmatpush3.bf16.msra.mxu0 %v2387_v7 }
 0x193   : > { %1938 = vmatprep.mubr.msk.f32.mxu1 %vm2228_vm2, %v2226_v0  ;;  %1945 = vmatprep.mubr.msk.f32.mxu0 %vm2228_vm2, %v2226_v0 }
 0x194   : > { %v1044_v18 = vpop.permute.xlu0 %1043  ;;  %v1118_v19 = vpop.permute.xlu1 %1117  ;;  %2020 = vmatprep.subr.bf16.mxu1 %v2227_v1  ;;  %2023 = vmatprep.subr.bf16.mxu0 %v2227_v1 }
 0x195   : > { %1939 = vmatmul.mubr.msk.f32.vlgmr.msra.gmra.mrb[8].mxu1 %vm304_vm3, %v299_v9  ;;  %1946 = vmatmul.mubr.msk.f32.vlgmr.msra.gmra.mrb[10].mxu0 %vm304_vm3, %v970_v17 }
 0x196   : > { %2022 = vmatpush3.bf16.msra.mxu1 %v2387_v7  ;;  %2025 = vmatpush3.bf16.msra.mxu0 %v2387_v7 }
 0x197   : > { %1959 = vmatprep.mubr.msk.f32.mxu0 %vm2228_vm2, %v2226_v0  ;;  %1952 = vmatprep.mubr.msk.f32.mxu1 %vm2228_vm2, %v2226_v0 }
 0x198   : > { %2026 = vmatprep.subr.bf16.mxu1 %v2227_v1  ;;  %2029 = vmatprep.subr.bf16.mxu0 %v2227_v1  ;;  %v1192_v20 = vpop.permute.xlu0 %1191  ;;  %v1266_v21 = vpop.permute.xlu1 %1265 }
 0x199   : > { %1953 = vmatmul.mubr.msk.f32.vlgmr.msra.gmra.mrb[10].mxu1 %vm304_vm3, %v1044_v18  ;;  %1960 = vmatmul.mubr.msk.f32.vlgmr.msra.gmra.mrb[12].mxu0 %vm304_vm3, %v1118_v19 }
 0x19a   : > { %2028 = vmatpush3.bf16.msra.mxu1 %v2387_v7  ;;  %2031 = vmatpush3.bf16.msra.mxu0 %v2387_v7 }
 0x19b   : > { %1973 = vmatprep.mubr.msk.f32.mxu0 %vm2228_vm2, %v2226_v0  ;;  %1966 = vmatprep.mubr.msk.f32.mxu1 %vm2228_vm2, %v2226_v0 }
 0x19c   : > { %2032 = vmatprep.subr.bf16.mxu1 %v2227_v1  ;;  %2035 = vmatprep.subr.bf16.mxu0 %v2227_v1  ;;  %v1340_v22 = vpop.permute.xlu0 %1339  ;;  %v1414_v23 = vpop.permute.xlu1 %1413 }
 0x19d   : > { %1967 = vmatmul.mubr.msk.f32.vlgmr.msra.gmra.mrb[12].mxu1 %vm304_vm3, %v1192_v20  ;;  %1974 = vmatmul.mubr.msk.f32.vlgmr.msra.gmra.mrb[14].mxu0 %vm304_vm3, %v1266_v21 }
 0x19e   : > { %2034 = vmatpush3.bf16.msra.mxu1 %v2387_v7  ;;  %2037 = vmatpush3.bf16.msra.mxu0 %v2387_v7 }
 0x19f   : > { %1980 = vmatprep.mubr.msk.f32.mxu1 %vm2228_vm2, %v2226_v0  ;;  %1987 = vmatprep.mubr.msk.f32.mxu0 %vm2228_vm2, %v2226_v0 }
 0x1a1   : > { %1981 = vmatmul.mubr.msk.f32.vlgmr.msra.gmra.mrb[14].mxu1 %vm304_vm3, %v1340_v22  ;;  %1988 = vmatmul.mubr.msk.f32.vlgmr.msra.gmra.mrb[16].mxu0 %vm304_vm3, %v1414_v23 }
 0x1e6   : > { %v2474_v24 = vpop.f32.mrb[0].mxu1 }
 0x1e7   : > { %v1884_v25 = vpop.f32.mrb[1].mxu1  ;;  %v1487_v27 = vmul.f32 0.75, %v2474_v24  ;;  %v1490_v28 = vmul.f32 0.25, %v2474_v24 }
 0x258   : > { %v448_v26 = vpop.f32.mrb[2].mxu0 }
 0x259   : > { %v1488_v29 = vmul.f32 0.25, %v448_v26  ;;  %v1491_v30 = vmul.f32 0.75, %v448_v26  ;;  %v1891_v31 = vpop.f32.mrb[3].mxu0 }
 0x25b   : > { %v1489_v32 = vadd.f32 %v1488_v29, %v1487_v27  ;;  %v1492_v33 = vadd.f32 %v1491_v30, %v1490_v28 }
 0x25c   : > { %v522_v34 = vpop.f32.mrb[2].mxu1  ;;  %v596_v35 = vpop.f32.mrb[4].mxu0 }
 0x25d   : > { %v1493_v36 = vmul.f32 0.25, %v522_v34  ;;  %v1495_v37 = vmul.f32 0.75, %v522_v34  ;;  %v1497_v38 = vmul.f32 0.25, %v596_v35  ;;  %v1499_v39 = vmul.f32 0.75, %v596_v35  ;;  %v1898_v40 = vpop.f32.mrb[3].mxu1  ;;  %1550 = vrot.lane.b32.xlu0 %v1489_v32, %s2233_s29  ;;  %v1905_v41 = vpop.f32.mrb[5].mxu0 }
 0x25f   : > { %v1494_v42 = vadd.f32 %v1493_v36, %v1491_v30  ;;  %v2479_v43 = vadd.f32 %v1495_v37, %v1488_v29  ;;  %v1498_v44 = vadd.f32 %v1497_v38, %v1495_v37  ;;  %v1500_v45 = vadd.f32 %v1499_v39, %v1493_v36 }
 0x260   : > { %v670_v46 = vpop.f32.mrb[4].mxu1  ;;  %v744_v47 = vpop.f32.mrb[6].mxu0 }
 0x261   : > { %v1501_v48 = vmul.f32 0.25, %v670_v46  ;;  %v1503_v49 = vmul.f32 0.75, %v670_v46  ;;  %v1505_v50 = vmul.f32 0.25, %v744_v47  ;;  %v1507_v51 = vmul.f32 0.75, %v744_v47  ;;  %v1912_v52 = vpop.f32.mrb[5].mxu1  ;;  %1554 = vrot.lane.b32.xlu0 %v1492_v33, %s2231_s23  ;;  %1562 = vrot.lane.b32.xlu1 %v1498_v44, %s2233_s29  ;;  %v1919_v53 = vpop.f32.mrb[7].mxu0 }
 0x263   : > { %v1502_v54 = vadd.f32 %v1501_v48, %v1499_v39  ;;  %v2483_v55 = vadd.f32 %v1503_v49, %v1497_v38  ;;  %v1506_v56 = vadd.f32 %v1505_v50, %v1503_v49  ;;  %v1508_v57 = vadd.f32 %v1507_v51, %v1501_v48 }
 0x264   : > { %v818_v58 = vpop.f32.mrb[6].mxu1  ;;  %v892_v59 = vpop.f32.mrb[8].mxu0 }
 0x265   : > { %v1509_v60 = vmul.f32 0.25, %v818_v58  ;;  %v1511_v61 = vmul.f32 0.75, %v818_v58  ;;  %v1513_v62 = vmul.f32 0.25, %v892_v59  ;;  %v1515_v63 = vmul.f32 0.75, %v892_v59  ;;  %v1926_v0 = vpop.f32.mrb[7].mxu1  ;;  %1558 = vrot.lane.b32.xlu0 %v1494_v42, %s2232_s28  ;;  %1566 = vrot.lane.b32.xlu1 %v1500_v45, %s2231_s23  ;;  %v1933_v1 = vpop.f32.mrb[9].mxu0 }
 0x267   : > { %v1510_v2 = vadd.f32 %v1509_v60, %v1507_v51  ;;  %v2487_v3 = vadd.f32 %v1511_v61, %v1505_v50  ;;  %v1514_v4 = vadd.f32 %v1513_v62, %v1511_v61  ;;  %v1516_v5 = vadd.f32 %v1515_v63, %v1509_v60 }
 0x268   : > { %v965_v6 = vpop.f32.mrb[8].mxu1  ;;  %v1039_v7 = vpop.f32.mrb[10].mxu0 }
 0x269   : > { %v1517_v8 = vmul.f32 0.25, %v965_v6  ;;  %v1519_v9 = vmul.f32 0.75, %v965_v6  ;;  %v1521_v10 = vmul.f32 0.25, %v1039_v7  ;;  %v1523_v11 = vmul.f32 0.75, %v1039_v7  ;;  %v1940_v12 = vpop.f32.mrb[9].mxu1  ;;  %1570 = vrot.lane.b32.xlu1 %v1502_v54, %s2232_s28  ;;  %1574 = vrot.lane.b32.xlu0 %v1506_v56, %s2233_s29  ;;  %v1947_v13 = vpop.f32.mrb[11].mxu0 }
 0x26b   : > { %v1518_v14 = vadd.f32 %v1517_v8, %v1515_v63  ;;  %v2491_v15 = vadd.f32 %v1519_v9, %v1513_v62  ;;  %v1522_v16 = vadd.f32 %v1521_v10, %v1519_v9  ;;  %v1524_v17 = vadd.f32 %v1523_v11, %v1517_v8 }
 0x26c   : > { %v1113_v18 = vpop.f32.mrb[10].mxu1  ;;  %v1187_v19 = vpop.f32.mrb[12].mxu0 }
 0x26d   : > { %v1525_v20 = vmul.f32 0.25, %v1113_v18  ;;  %v1527_v21 = vmul.f32 0.75, %v1113_v18  ;;  %v1529_v22 = vmul.f32 0.25, %v1187_v19  ;;  %v1531_v23 = vmul.f32 0.75, %v1187_v19  ;;  %v1954_v25 = vpop.f32.mrb[11].mxu1  ;;  %1578 = vrot.lane.b32.xlu0 %v1508_v57, %s2231_s23  ;;  %1586 = vrot.lane.b32.xlu1 %v1514_v4, %s2233_s29  ;;  %v1961_v26 = vpop.f32.mrb[13].mxu0 }
 0x26f   : > { %v1526_v27 = vadd.f32 %v1525_v20, %v1523_v11  ;;  %v2495_v28 = vadd.f32 %v1527_v21, %v1521_v10  ;;  %v1530_v29 = vadd.f32 %v1529_v22, %v1527_v21  ;;  %v1532_v30 = vadd.f32 %v1531_v23, %v1525_v20 }
 0x270   : > { %v1261_v31 = vpop.f32.mrb[12].mxu1  ;;  %v1335_v32 = vpop.f32.mrb[14].mxu0 }
 0x271   : > { %v1533_v33 = vmul.f32 0.25, %v1261_v31  ;;  %v1535_v34 = vmul.f32 0.75, %v1261_v31  ;;  %v1537_v35 = vmul.f32 0.25, %v1335_v32  ;;  %v1539_v36 = vmul.f32 0.75, %v1335_v32  ;;  %v1968_v37 = vpop.f32.mrb[13].mxu1  ;;  %1582 = vrot.lane.b32.xlu0 %v1510_v2, %s2232_s28  ;;  %1590 = vrot.lane.b32.xlu1 %v1516_v5, %s2231_s23  ;;  %v1975_v38 = vpop.f32.mrb[15].mxu0 }
 0x273   : > { %v1534_v39 = vadd.f32 %v1533_v33, %v1531_v23  ;;  %v2499_v40 = vadd.f32 %v1535_v34, %v1529_v22  ;;  %v1538_v41 = vadd.f32 %v1537_v35, %v1535_v34  ;;  %v1540_v42 = vadd.f32 %v1539_v36, %v1533_v33 }
 0x274   : > { %v1409_v44 = vpop.f32.mrb[14].mxu1  ;;  %v1483_v45 = vpop.f32.mrb[16].mxu0 }
 0x275   : > { %v1541_v46 = vmul.f32 0.25, %v1409_v44  ;;  %v1543_v47 = vmul.f32 0.75, %v1409_v44  ;;  %v1545_v48 = vmul.f32 0.25, %v1483_v45  ;;  %v1547_v49 = vmul.f32 0.75, %v1483_v45  ;;  %v1982_v50 = vpop.f32.mrb[15].mxu1  ;;  %1594 = vrot.lane.b32.xlu1 %v1518_v14, %s2232_s28  ;;  %1613 = vrot.lane.b32.xlu0 %v1522_v16, %s2233_s29  ;;  %v1989_v51 = vpop.f32.mrb[17].mxu0 }
 0x277   : > { %v1542_v52 = vadd.f32 %v1541_v46, %v1539_v36  ;;  %v2503_v53 = vadd.f32 %v1543_v47, %v1537_v35  ;;  %v1546_v54 = vadd.f32 %v1545_v48, %v1543_v47  ;;  %v1548_v56 = vadd.f32 %v1547_v49, %v1541_v46 }
 0x279   : > { %1617 = vrot.lane.b32.xlu0 %v1524_v17, %s2231_s23  ;;  %1625 = vrot.lane.b32.xlu1 %v1530_v29, %s2233_s29 }
 0x27d   : > { %1621 = vrot.lane.b32.xlu0 %v1526_v27, %s2232_s28  ;;  %1629 = vrot.lane.b32.xlu1 %v1532_v30, %s2231_s23 }
 0x281   : > { %1633 = vrot.lane.b32.xlu1 %v1534_v39, %s2232_s28  ;;  %1637 = vrot.lane.b32.xlu0 %v1538_v41, %s2233_s29 }
 0x285   : > { %1641 = vrot.lane.b32.xlu0 %v1540_v42, %s2231_s23  ;;  %1649 = vrot.lane.b32.xlu1 %v1546_v54, %s2233_s29 }
 0x289   : > { %1645 = vrot.lane.b32.xlu0 %v1542_v52, %s2232_s28  ;;  %1653 = vrot.lane.b32.xlu1 %v1548_v56, %s2231_s23 }
 0x28d   : > { %1657 = vrot.lane.b32.xlu1 %v1483_v45, %s2232_s28 }
 0x2cf   : > { %v1551_v57 = vpop.permute.xlu0 %1550 }
 0x2d0   : > { %v1598_v60 = vsel %vm1597_vm4, %v2474_v24, %v1551_v57 }
 0x2d3   : > { %v1555_v58 = vpop.permute.xlu0 %1554  ;;  %v1563_v59 = vpop.permute.xlu1 %1562 }
 0x2d4   : > { %v1600_v61 = vsel %vm1599_vm5, %v1598_v60, %v1555_v58  ;;  %v1603_v1 = vsel %vm1597_vm4, %v2479_v43, %v1563_v59 }
 0x2d7   : > { %v1559_v62 = vpop.permute.xlu0 %1558  ;;  %v1567_v63 = vpop.permute.xlu1 %1566 }
 0x2d8   : > { %v1602_v0 = vsel %vm1601_vm6, %v1600_v61, %v1559_v62  ;;  %v1604_v2 = vsel %vm1599_vm5, %v1603_v1, %v1567_v63 }
 0x2d9   : > { %1672 = vst [vmem:[%s2521_s11] sm:$0xff] %v1602_v0 }
 0x2db   : > { %v1571_v4 = vpop.permute.xlu1 %1570  ;;  %v1575_v5 = vpop.permute.xlu0 %1574 }
 0x2dc   : > { %v1605_v24 = vsel %vm1601_vm6, %v1604_v2, %v1571_v4  ;;  %v1606_v8 = vsel %vm1597_vm4, %v2483_v55, %v1575_v5 }
 0x2dd   : > { %1673 = vst [vmem:[%s2521_s11 + $0x8] sm:$0xff] %v1605_v24 }
 0x2df   : > { %v1579_v6 = vpop.permute.xlu0 %1578  ;;  %v1587_v7 = vpop.permute.xlu1 %1586 }
 0x2e0   : > { %v1607_v9 = vsel %vm1599_vm5, %v1606_v8, %v1579_v6  ;;  %v1609_v12 = vsel %vm1597_vm4, %v2487_v3, %v1587_v7 }
 0x2e3   : > { %v1583_v10 = vpop.permute.xlu0 %1582  ;;  %v1591_v11 = vpop.permute.xlu1 %1590 }
 0x2e4   : > { %v1608_v43 = vsel %vm1601_vm6, %v1607_v9, %v1583_v10  ;;  %v1610_v13 = vsel %vm1599_vm5, %v1609_v12, %v1591_v11 }
 0x2e5   : > { %1674 = vst [vmem:[%s2521_s11 + $0x10] sm:$0xff] %v1608_v43 }
 0x2e7   : > { %v1595_v14 = vpop.permute.xlu1 %1594  ;;  %v1614_v16 = vpop.permute.xlu0 %1613 }
 0x2e8   : > { %v1611_v17 = vsel %vm1601_vm6, %v1610_v13, %v1595_v14  ;;  %v1660_v19 = vsel %vm1597_vm4, %v2491_v15, %v1614_v16 }
 0x2e9   : > { %1675 = vst [vmem:[%s2521_s11 + $0x18] sm:$0xff] %v1611_v17 }
 0x2eb   : > { %v1618_v55 = vpop.permute.xlu0 %1617  ;;  %v1626_v18 = vpop.permute.xlu1 %1625 }
 0x2ec   : > { %v1661_v20 = vsel %vm1599_vm5, %v1660_v19, %v1618_v55  ;;  %v1663_v23 = vsel %vm1597_vm4, %v2495_v28, %v1626_v18 }
 0x2ef   : > { %v1622_v21 = vpop.permute.xlu0 %1621  ;;  %v1630_v22 = vpop.permute.xlu1 %1629 }
 0x2f0   : > { %v1662_v3 = vsel %vm1601_vm6, %v1661_v20, %v1622_v21  ;;  %v1664_v25 = vsel %vm1599_vm5, %v1663_v23, %v1630_v22 }
 0x2f1   : > { %1676 = vst [vmem:[%s2521_s11 + $0x20] sm:$0xff] %v1662_v3 }
 0x2f3   : > { %v1634_v26 = vpop.permute.xlu1 %1633  ;;  %v1638_v27 = vpop.permute.xlu0 %1637 }
 0x2f4   : > { %v1665_v29 = vsel %vm1601_vm6, %v1664_v25, %v1634_v26  ;;  %v1666_v31 = vsel %vm1597_vm4, %v2499_v40, %v1638_v27 }
 0x2f5   : > { %1677 = vst [vmem:[%s2521_s11 + $0x28] sm:$0xff] %v1665_v29 }
 0x2f7   : > { %v1642_v15 = vpop.permute.xlu0 %1641  ;;  %v1650_v30 = vpop.permute.xlu1 %1649 }
 0x2f8   : > { %v1667_v32 = vsel %vm1599_vm5, %v1666_v31, %v1642_v15  ;;  %v1669_v35 = vsel %vm1597_vm4, %v2503_v53, %v1650_v30 }
 0x2fb   : > { %v1646_v33 = vpop.permute.xlu0 %1645  ;;  %v1654_v34 = vpop.permute.xlu1 %1653 }
 0x2fc   : > { %v1668_v28 = vsel %vm1601_vm6, %v1667_v32, %v1646_v33  ;;  %v1670_v36 = vsel %vm1599_vm5, %v1669_v35, %v1654_v34 }
 0x2fd   : > { %1678 = vst [vmem:[%s2521_s11 + $0x30] sm:$0xff] %v1668_v28 }
 0x2ff   : > { %v1658_v37 = vpop.permute.xlu1 %1657 }
 0x300   : > { %v1671_v38 = vsel %vm1601_vm6, %v1670_v36, %v1658_v37 }
 0x301   : > { %1679 = vst [vmem:[%s2521_s11 + $0x38] sm:$0xff] %v1671_v38 }
 0x302   : > { %2154 = shalt.err (!%p2151_p6)
}
 0x303   : > { %s2155_s5 = scalar_lea.hbm %s2562_s10, 1024  ;;  %s2159_s29 = scalar_lea.hbm %s2616_s3, 2048 }
 0x304   : > { %p2156_p4 = scmp.ne.s32.totalorder %s2562_s10, %s2155_s5  ;;  %p2160_p1 = scmp.lt.u32.totalorder %s2562_s10, %s2616_s3 }
 0x305   : > { %p2161_p2 = scmp.lt.u32.totalorder %s2159_s29, %s2155_s5  ;;  %p2163_p8 = scmp.lt.u32.totalorder %s2155_s5, %s2562_s10 }
 0x306   : > { %p2157_p10 = pnand %p2156_p4, %p2625_p9 }
 0x307   : > { %p2162_p5 = por %p2161_p2, %p2160_p1 }
 0x308   : > { %p2158_p12 = pneg %p2157_p10 }
 0x309   : > { %p2164_p11 = por %p2163_p8, %p2162_p5 }
 0x30b   : > { %p2165_p0 = pnand %p2164_p11, %p2158_p12 }
 0x30d   : > { %2168 = shalt.err (!%p2165_p0)
}
 0x30e   : > { %2040 = dma.vmem_to_hbm [thread:$0]  (%p2625_p9), %s2564_s6, 1024, %s2562_s10, %s1681_s15  }
 0x30f PF: > { %s1709_s7 = sand.u32 1, %s2203_s12   ;;  %p2626_p7 = scmp.ne.s32.totalorder %s2621_s27, 0 }
 0x310   : > { %p2627_p13 = scmp.ge.s32.totalorder %s2223_s17, 2  ;;  %s1710_s11 = scalar_lea.sflag [#allocation4], %s1709_s7 }
 0x312   : > { %p2047_p3 = pnand %p2627_p13, %p2626_p7 }
 0x314   : > { %2198 = dma.done.wait (!%p2047_p3), %s1710_s11, 1024  }
 0x315   : > { %2200 = vsyncadd (!%p2047_p3), %s1710_s11, 4294966272  ;;  %s19_s17 = sadd.s32 1, %s2223_s17   ;;  %s2628_s12 = smov %s2207_s13 }
 0x316   : > { %p16_p6 = scmp.ge.s32.totalorder %s19_s17, 4   ;;  %s2629_s13 = smov %s2211_s14 }
 0x317   : > { %s2630_s14 = smov %s2313_s26  ;;  %s2631_s15 = smov %s2219_s16 }
 0x318   : > { %s2632_s16 = smov %s2634_s20  ;;  %18 = sbr.rel (!%p16_p6) target bundleno = 6 (0x6), region = 80 }
 0x31f   :  { %1715 = vsyncpa [#allocation3], 1 }
 0x320   :  { %1717 = vsyncpa [#allocation3 + $0x1], 1 }
 0x321   :  { %1718 = vsyncpa [#allocation4], 1 }
 0x322   :  { %1720 = vsyncpa [#allocation4 + $0x1], 1 }

</bundles_post_ra>
